<compile_context>
chip_gen: v7x
topology: tpu7x:2x2x1
jax: 0.10.0
libtpu: 0.0.40
codegen_flags: <defaults>
</compile_context>

<pallas_src>
import jax
import jax.numpy as jnp
from jax.experimental import pallas as pl
from jax.experimental.pallas import tpu as pltpu
import numpy as np


def _channel_gate_kernel(x_ref, w1t_ref, b1_ref, w2m_ref, b2m_ref,
                         out_ref, scale_ref):
    # x_ref:     (TB, C, HW)  TB batch elements; channels on sublanes, spatial on lanes
    # w1t_ref:   (1, C, Hd)   first Linear weight, transposed (W1.T)
    # b1_ref:    (1, 1, Hd)   first Linear bias
    # w2m_ref:   (1, C, Hd)   M @ W2   (4x4 group-averaging folded into second Linear)
    # b2m_ref:   (1, C, 1)    2 * (M @ b2)   (b2 added once per pool type: avg + max)
    # out_ref:   (TB, C, HW)  gated output x * scale
    # scale_ref: (TB, C, 1)   per-channel sigmoid gate (compact / broadcastable)
    x = x_ref[...].astype(jnp.float32)                                   # (TB, C, HW)
    inv_hw = 1.0 / x.shape[-1]

    # Global average / max pooling over the spatial (lane) axis.
    avg3 = jnp.sum(x, axis=-1, keepdims=True) * inv_hw                   # (TB, C, 1)
    mx3 = jnp.max(x, axis=-1, keepdims=True)                             # (TB, C, 1)

    w1t = w1t_ref[...]                                                   # (1, C, Hd)
    b1 = b1_ref[...]                                                     # (1, 1, Hd)
    w2m = w2m_ref[...]                                                   # (1, C, Hd)
    b2m = b2m_ref[...]                                                   # (1, C, 1)

    # hidden = relu(W1 @ pooled + b1): broadcast multiply + channel (sublane) reduce.
    h_avg = jnp.maximum(jnp.sum(w1t * avg3, axis=1, keepdims=True) + b1, 0.0)  # (TB,1,Hd)
    h_max = jnp.maximum(jnp.sum(w1t * mx3, axis=1, keepdims=True) + b1, 0.0)   # (TB,1,Hd)
    h = h_avg + h_max                                                          # (TB,1,Hd)

    # att = (M @ W2) @ h + 2*(M @ b2): broadcast multiply + lane reduce.
    att = jnp.sum(w2m * h, axis=-1, keepdims=True) + b2m                 # (TB, C, 1)
    scale = 1.0 / (1.0 + jnp.exp(-att))                                  # (TB, C, 1)

    out_ref[...] = (x * scale).astype(out_ref.dtype)
    scale_ref[...] = scale.astype(scale_ref.dtype)


def channel_gate_forward(x_nchw, w1, b1, w2, b2, *, batch_tile=128):
    """ChannelGate forward. x_nchw: (N, C, H, W) with C == 16 (module hard-codes
    reshape(N, 4, 4)).  Returns (x * scale, scale) where scale is the compact
    broadcastable (N, C, 1, 1) gate (PyTorch's expand_as is a view; values match)."""
    N, C, H, W = x_nchw.shape
    assert C == 16, "ChannelGate.forward hard-codes reshape(N, 4, 4) -> C must be 16"
    Hd = w1.shape[0]
    HW = H * W
    TB = max(1, min(batch_tile, N))   # tune per generation: 128 (v5e) .. 256-512 (v6e/v7x)

    # Free reshape (no transpose): channels -> sublanes, spatial -> lanes.
    x_r = x_nchw.reshape(N, C, HW)

    # Host-side constant folding (assumes pool_types == ['avg', 'max']):
    #   avg_weight = M @ (MLP(avg) + MLP(max)),  M[i, j] = 0.25 if i//4 == j//4 else 0
    #   => avg_weight = (M @ W2) @ (h_avg + h_max) + 2 * (M @ b2)
    group = jnp.arange(C) // 4
    M = (group[:, None] == group[None, :]).astype(jnp.float32) * 0.25    # (C, C)
    w2m = (M @ w2.astype(jnp.float32)).reshape(1, C, Hd)                 # (1, C, Hd)
    b2m = (2.0 * (M @ b2.astype(jnp.float32))).reshape(1, C, 1)          # (1, C, 1)
    w1t = jnp.transpose(w1.astype(jnp.float32)).reshape(1, C, Hd)        # (1, C, Hd)
    b1r = b1.astype(jnp.float32).reshape(1, 1, Hd)                       # (1, 1, Hd)

    out_r, scale_nc1 = pl.pallas_call(
        _channel_gate_kernel,
        out_shape=(
            jax.ShapeDtypeStruct((N, C, HW), x_nchw.dtype),
            jax.ShapeDtypeStruct((N, C, 1), jnp.float32),
        ),
        grid_spec=pltpu.PrefetchScalarGridSpec(
            num_scalar_prefetch=0,
            grid=(pl.cdiv(N, TB),),
            in_specs=[
                pl.BlockSpec((TB, C, HW), lambda n: (n, 0, 0)),
                pl.BlockSpec((1, C, Hd), lambda n: (0, 0, 0)),
                pl.BlockSpec((1, 1, Hd), lambda n: (0, 0, 0)),
                pl.BlockSpec((1, C, Hd), lambda n: (0, 0, 0)),
                pl.BlockSpec((1, C, 1), lambda n: (0, 0, 0)),
            ],
            out_specs=[
                pl.BlockSpec((TB, C, HW), lambda n: (n, 0, 0)),
                pl.BlockSpec((TB, C, 1), lambda n: (n, 0, 0)),
            ],
        ),
        compiler_params=pltpu.CompilerParams(
            dimension_semantics=("parallel",),
            vmem_limit_bytes=32 * 1024 * 1024,
        ),
    )(x_r, w1t, b1r, w2m, b2m)

    out = out_r.reshape(N, C, H, W)
    scale = scale_nc1.reshape(N, C, 1, 1)   # compact; broadcasts like scale.expand_as(x)
    return out, scale


def _reference_forward(x, w1, b1, w2, b2):
    """Pure-JAX reference mirroring PyTorch ChannelGate (pool_types=['avg','max'])."""
    N, C, H, W = x.shape
    avg_pool = jnp.mean(x, axis=(2, 3))                                  # (N, C)
    max_pool = jnp.max(x, axis=(2, 3))                                   # (N, C)

    def mlp(v):
        h = jnp.maximum(v @ w1.T + b1, 0.0)
        return h @ w2.T + b2

    att = mlp(avg_pool) + mlp(max_pool)                                  # (N, C)
    att = att.reshape(N, 4, 4)
    avg_w = jnp.broadcast_to(jnp.mean(att, axis=2, keepdims=True), (N, 4, 4)).reshape(N, C)
    scale = jax.nn.sigmoid(avg_w).reshape(N, C, 1, 1)                    # (N, C, 1, 1)
    return x * scale, scale


if __name__ == "__main__":
    # gate_channels must be 16 (module reshapes the attention vector to (N, 4, 4)).
    N, C, H, W = 2, 16, 16, 16
    reduction_ratio = 4
    Hd = C // reduction_ratio

    key = jax.random.PRNGKey(0)
    kx, k1, k2, k3, k4 = jax.random.split(key, 5)

    x = jax.random.normal(kx, (N, C, H, W), dtype=jnp.float32)
    w1 = 0.3 * jax.random.normal(k1, (Hd, C), dtype=jnp.float32)   # nn.Linear(C, C//r).weight
    b1 = 0.1 * jax.random.normal(k2, (Hd,), dtype=jnp.float32)     # nn.Linear(C, C//r).bias
    w2 = 0.3 * jax.random.normal(k3, (C, Hd), dtype=jnp.float32)   # nn.Linear(C//r, C).weight
    b2 = 0.1 * jax.random.normal(k4, (C,), dtype=jnp.float32)      # nn.Linear(C//r, C).bias

    out, scale = channel_gate_forward(x, w1, b1, w2, b2)
    out = jax.block_until_ready(out)
    scale = jax.block_until_ready(scale)

    ref_out, ref_scale = _reference_forward(x, w1, b1, w2, b2)
    np.testing.assert_allclose(np.asarray(out), np.asarray(ref_out), rtol=1e-4, atol=1e-5)
    np.testing.assert_allclose(np.asarray(scale), np.asarray(ref_scale), rtol=1e-4, atol=1e-5)
    assert out.shape == (N, C, H, W) and scale.shape == (N, C, 1, 1)
    print("KERNEL_OK")
</pallas_src>

<mosaic_0001>
module attributes {stable_mosaic.version = 11 : i64} {
  func.func @_channel_gate_kernel(%arg0: i32, %arg1: memref<2x16x256xf32, #tpu.memory_space<vmem>>, %arg2: memref<1x16x4xf32, #tpu.memory_space<vmem>>, %arg3: memref<1x1x4xf32, #tpu.memory_space<vmem>>, %arg4: memref<1x16x4xf32, #tpu.memory_space<vmem>>, %arg5: memref<1x16x1xf32, #tpu.memory_space<vmem>>, %arg6: memref<2x16x256xf32, #tpu.memory_space<vmem>>, %arg7: memref<2x16x1xf32, #tpu.memory_space<vmem>>) attributes {dimension_semantics = [#tpu.dimension_semantics<parallel>], iteration_bounds = array<i64: 1>, scalar_prefetch = 0 : i64, scratch_operands = 0 : i64, tpu.core_type = #tpu.core_type<tc>, window_params = [{transform_indices = @transform_0, window_bounds = array<i64: 2, 16, 256>}, {pipeline_mode = #tpu.pipeline_mode<synchronous>, transform_indices = @transform_1, window_bounds = array<i64: 1, 16, 4>}, {pipeline_mode = #tpu.pipeline_mode<synchronous>, transform_indices = @transform_2, window_bounds = array<i64: 1, 1, 4>}, {pipeline_mode = #tpu.pipeline_mode<synchronous>, transform_indices = @transform_3, window_bounds = array<i64: 1, 16, 4>}, {pipeline_mode = #tpu.pipeline_mode<synchronous>, transform_indices = @transform_4, window_bounds = array<i64: 1, 16, 1>}, {transform_indices = @transform_5, window_bounds = array<i64: 2, 16, 256>}, {transform_indices = @transform_6, window_bounds = array<i64: 2, 16, 1>}]} {
    %c0 = arith.constant 0 : index
    %c0_0 = arith.constant 0 : index
    %c0_1 = arith.constant 0 : index
    %0 = vector.load %arg1[%c0, %c0_0, %c0_1] : memref<2x16x256xf32, #tpu.memory_space<vmem>>, vector<2x16x256xf32>
    %cst = arith.constant dense<0.000000e+00> : vector<2x16xf32>
    %1 = vector.multi_reduction <add>, %0, %cst [2] : vector<2x16x256xf32> to vector<2x16xf32>
    %2 = vector.shape_cast %1 : vector<2x16xf32> to vector<2x16x1xf32>
    %cst_2 = arith.constant 3.906250e-03 : f32
    %3 = vector.broadcast %cst_2 : f32 to vector<2x16x1xf32>
    %4 = arith.mulf %2, %3 : vector<2x16x1xf32>
    %cst_3 = arith.constant dense<0xFF800000> : vector<2x16xf32>
    %5 = vector.multi_reduction <maximumf>, %0, %cst_3 [2] : vector<2x16x256xf32> to vector<2x16xf32>
    %6 = vector.shape_cast %5 : vector<2x16xf32> to vector<2x16x1xf32>
    %c0_4 = arith.constant 0 : index
    %c0_5 = arith.constant 0 : index
    %c0_6 = arith.constant 0 : index
    %7 = vector.load %arg2[%c0_4, %c0_5, %c0_6] : memref<1x16x4xf32, #tpu.memory_space<vmem>>, vector<1x16x4xf32>
    %c0_7 = arith.constant 0 : index
    %c0_8 = arith.constant 0 : index
    %c0_9 = arith.constant 0 : index
    %8 = vector.load %arg3[%c0_7, %c0_8, %c0_9] : memref<1x1x4xf32, #tpu.memory_space<vmem>>, vector<1x1x4xf32>
    %c0_10 = arith.constant 0 : index
    %c0_11 = arith.constant 0 : index
    %c0_12 = arith.constant 0 : index
    %9 = vector.load %arg4[%c0_10, %c0_11, %c0_12] : memref<1x16x4xf32, #tpu.memory_space<vmem>>, vector<1x16x4xf32>
    %c0_13 = arith.constant 0 : index
    %c0_14 = arith.constant 0 : index
    %c0_15 = arith.constant 0 : index
    %10 = vector.load %arg5[%c0_13, %c0_14, %c0_15] : memref<1x16x1xf32, #tpu.memory_space<vmem>>, vector<1x16x1xf32>
    %11 = vector.broadcast %7 : vector<1x16x4xf32> to vector<2x16x4xf32>
    %12 = vector.broadcast %4 : vector<2x16x1xf32> to vector<2x16x4xf32>
    %13 = arith.mulf %11, %12 : vector<2x16x4xf32>
    %cst_16 = arith.constant dense<0.000000e+00> : vector<2x4xf32>
    %14 = vector.multi_reduction <add>, %13, %cst_16 [1] : vector<2x16x4xf32> to vector<2x4xf32>
    %15 = vector.shape_cast %14 : vector<2x4xf32> to vector<2x1x4xf32>
    %16 = vector.broadcast %8 : vector<1x1x4xf32> to vector<2x1x4xf32>
    %17 = arith.addf %15, %16 : vector<2x1x4xf32>
    %cst_17 = arith.constant 0.000000e+00 : f32
    %18 = vector.broadcast %cst_17 : f32 to vector<2x1x4xf32>
    %19 = arith.maximumf %17, %18 : vector<2x1x4xf32>
    %20 = vector.broadcast %7 : vector<1x16x4xf32> to vector<2x16x4xf32>
    %21 = vector.broadcast %6 : vector<2x16x1xf32> to vector<2x16x4xf32>
    %22 = arith.mulf %20, %21 : vector<2x16x4xf32>
    %cst_18 = arith.constant dense<0.000000e+00> : vector<2x4xf32>
    %23 = vector.multi_reduction <add>, %22, %cst_18 [1] : vector<2x16x4xf32> to vector<2x4xf32>
    %24 = vector.shape_cast %23 : vector<2x4xf32> to vector<2x1x4xf32>
    %25 = vector.broadcast %8 : vector<1x1x4xf32> to vector<2x1x4xf32>
    %26 = arith.addf %24, %25 : vector<2x1x4xf32>
    %cst_19 = arith.constant 0.000000e+00 : f32
    %27 = vector.broadcast %cst_19 : f32 to vector<2x1x4xf32>
    %28 = arith.maximumf %26, %27 : vector<2x1x4xf32>
    %29 = arith.addf %19, %28 : vector<2x1x4xf32>
    %30 = vector.broadcast %9 : vector<1x16x4xf32> to vector<2x16x4xf32>
    %31 = vector.broadcast %29 : vector<2x1x4xf32> to vector<2x16x4xf32>
    %32 = arith.mulf %30, %31 : vector<2x16x4xf32>
    %cst_20 = arith.constant dense<0.000000e+00> : vector<2x16xf32>
    %33 = vector.multi_reduction <add>, %32, %cst_20 [2] : vector<2x16x4xf32> to vector<2x16xf32>
    %34 = vector.shape_cast %33 : vector<2x16xf32> to vector<2x16x1xf32>
    %35 = vector.broadcast %10 : vector<1x16x1xf32> to vector<2x16x1xf32>
    %36 = arith.addf %34, %35 : vector<2x16x1xf32>
    %cst_21 = arith.constant 0.000000e+00 : f32
    %37 = vector.broadcast %cst_21 : f32 to vector<2x16x1xf32>
    %38 = arith.subf %37, %36 : vector<2x16x1xf32>
    %39 = math.exp %38 : vector<2x16x1xf32>
    %cst_22 = arith.constant 1.000000e+00 : f32
    %40 = vector.broadcast %cst_22 : f32 to vector<2x16x1xf32>
    %41 = arith.addf %40, %39 : vector<2x16x1xf32>
    %cst_23 = arith.constant 1.000000e+00 : f32
    %42 = vector.broadcast %cst_23 : f32 to vector<2x16x1xf32>
    %43 = arith.divf %42, %41 : vector<2x16x1xf32>
    %44 = vector.broadcast %43 : vector<2x16x1xf32> to vector<2x16x256xf32>
    %45 = arith.mulf %0, %44 : vector<2x16x256xf32>
    %c0_24 = arith.constant 0 : index
    %c0_25 = arith.constant 0 : index
    %c0_26 = arith.constant 0 : index
    %46 = vector.load %arg6[%c0_24, %c0_25, %c0_26] : memref<2x16x256xf32, #tpu.memory_space<vmem>>, vector<2x16x256xf32>
    tpu.vector_store %arg6[%c0_24, %c0_25, %c0_26], %45 {strides = array<i32>} : memref<2x16x256xf32, #tpu.memory_space<vmem>>, vector<2x16x256xf32>,
    %c0_27 = arith.constant 0 : index
    %c0_28 = arith.constant 0 : index
    %c0_29 = arith.constant 0 : index
    %47 = vector.load %arg7[%c0_27, %c0_28, %c0_29] : memref<2x16x1xf32, #tpu.memory_space<vmem>>, vector<2x16x1xf32>
    tpu.vector_store %arg7[%c0_27, %c0_28, %c0_29], %43 {strides = array<i32>} : memref<2x16x1xf32, #tpu.memory_space<vmem>>, vector<2x16x1xf32>,
    return
  }
  func.func @transform_0(%arg0: i32) -> (i32, i32, i32) {
    %c0_i32 = arith.constant 0 : i32
    %c0_i32_0 = arith.constant 0 : i32
    %c0_i32_1 = arith.constant 0 : i32
    return %arg0, %c0_i32, %c0_i32_0 : i32, i32, i32
  }
  func.func @transform_1(%arg0: i32) -> (i32, i32, i32) {
    %c0_i32 = arith.constant 0 : i32
    %c0_i32_0 = arith.constant 0 : i32
    %c0_i32_1 = arith.constant 0 : i32
    %c0_i32_2 = arith.constant 0 : i32
    return %c0_i32, %c0_i32_0, %c0_i32_1 : i32, i32, i32
  }
  func.func @transform_2(%arg0: i32) -> (i32, i32, i32) {
    %c0_i32 = arith.constant 0 : i32
    %c0_i32_0 = arith.constant 0 : i32
    %c0_i32_1 = arith.constant 0 : i32
    %c0_i32_2 = arith.constant 0 : i32
    return %c0_i32, %c0_i32_0, %c0_i32_1 : i32, i32, i32
  }
  func.func @transform_3(%arg0: i32) -> (i32, i32, i32) {
    %c0_i32 = arith.constant 0 : i32
    %c0_i32_0 = arith.constant 0 : i32
    %c0_i32_1 = arith.constant 0 : i32
    %c0_i32_2 = arith.constant 0 : i32
    return %c0_i32, %c0_i32_0, %c0_i32_1 : i32, i32, i32
  }
  func.func @transform_4(%arg0: i32) -> (i32, i32, i32) {
    %c0_i32 = arith.constant 0 : i32
    %c0_i32_0 = arith.constant 0 : i32
    %c0_i32_1 = arith.constant 0 : i32
    %c0_i32_2 = arith.constant 0 : i32
    return %c0_i32, %c0_i32_0, %c0_i32_1 : i32, i32, i32
  }
  func.func @transform_5(%arg0: i32) -> (i32, i32, i32) {
    %c0_i32 = arith.constant 0 : i32
    %c0_i32_0 = arith.constant 0 : i32
    %c0_i32_1 = arith.constant 0 : i32
    return %arg0, %c0_i32, %c0_i32_0 : i32, i32, i32
  }
  func.func @transform_6(%arg0: i32) -> (i32, i32, i32) {
    %c0_i32 = arith.constant 0 : i32
    %c0_i32_0 = arith.constant 0 : i32
    %c0_i32_1 = arith.constant 0 : i32
    return %arg0, %c0_i32, %c0_i32_0 : i32, i32, i32
  }
}

</mosaic_0001>

<bundles_post_ra>
// kernel: tpu_custom_call.1
= control target key start
LH: loop header
LB: loop body
LE: loop exit
PB: predicated region body
PF: predicated region fallthrough
CT: control target
= control target key end

     0   :  { %12 = vsyncpa [#allocation3], 0  ;;  %s475_s0 = inlined_call_operand.hbm [shape: f32[2,16,256], index: 0, kind: input, shape index: {}]   ;;  %s476_s1 = inlined_call_operand.vmem [shape: f32[1,16,4], index: 1, kind: input, shape index: {}]   ;;  %s477_s2 = inlined_call_operand.vmem [shape: f32[1,1,4], index: 2, kind: input, shape index: {}]   ;;  %s478_s3 = inlined_call_operand.vmem [shape: f32[1,16,4], index: 3, kind: input, shape index: {}]   ;;  %s479_s4 = inlined_call_operand.vmem [shape: f32[1,16,1], index: 4, kind: input, shape index: {}]   ;;  %s480_s5 = inlined_call_operand.hbm [shape: f32[2,16,256], index: 5, kind: output, shape index: {0}]   ;;  %s481_s6 = inlined_call_operand.vmem [shape: f32[2,16,1], index: 6, kind: output, shape index: {1}]  }
   0x1   :  { %13 = vsyncpa [#allocation4], 0  ;;  %s320_s21 = smov [#allocation2]   ;;  %s272_s25 = scalar_lea.hbm %s475_s0, 1024 }
   0x2   :  { %s19_s22 = sshll.u32 %s320_s21, 4  ;;  %p273_p0 = scmp.ne.s32.totalorder %s475_s0, %s272_s25  ;;  %s20_s22 = int_to_ptr.vmem [resolvable:$true] %s19_s22 }
   0x3   :  { %p276_p1 = scmp.lt.u32.totalorder %s272_s25, %s475_s0 }
   0x5   :  { %p278_p2 = pnand %p276_p1, %p273_p0 }
   0x7   :  { %281 = shalt.err (!%p278_p2)
}
   0x8   :  { %s282_s30 = scalar_lea.vmem %s20_s22, 1024  ;;  %p287_p4 = scmp.lt.s32.totalorder %s20_s22, %s20_s22 }
   0x9   :  { %p283_p3 = scmp.ne.s32.totalorder %s20_s22, %s282_s30  ;;  %p288_p5 = scmp.lt.s32.totalorder %s282_s30, %s282_s30 }
   0xb   :  { %p289_p6 = por %p288_p5, %p287_p4 }
   0xd   :  { %p290_p7 = pnand %p289_p6, %p283_p3 }
   0xf   :  { %293 = shalt.err (!%p290_p7)
}
  0x10   :  { %s321_s7 = smov 256   ;;  %s322_s8 = smov 16  }
  0x11   :  { %25 = dma.hbm_to_vmem [thread:$0]  %s475_s0, 1024, %s20_s22, [#allocation3], %s321_s7, %s321_s7, %s322_s8  }
  0x12   :  { %316 = dma.done.wait [#allocation3], 1024  }
  0x13   :  { %317 = vsyncadd [#allocation3], 4294966272  ;;  %v375_v0 = vld [vmem:[#allocation2 + $0x20] sm:$0xff]  ;;  %v377_v1 = vld [vmem:[#allocation2 + $0x28] sm:$0xff]  ;;  %vm84_vm0 = vcmask 31744   ;;  %v135_v62 = vlaneseq  ;;  %vm223_vm1 = vcmask 7168  }
  0x14   :  { %v379_v2 = vld [vmem:[#allocation2] sm:$0xff]  ;;  %v51_v3 = vadd.f32 %v377_v1, %v375_v0  ;;  %v383_v4 = vld [vmem:[#allocation2 + $0x8] sm:$0xff]  ;;  %v385_v5 = vld [vmem:[#allocation2 + $0x30] sm:$0xff]  ;;  %v67_v15 = vmax.f32 %v375_v0, %v377_v1 }
  0x15   :  { %v387_v6 = vld [vmem:[#allocation2 + $0x38] sm:$0xff]  ;;  %v45_v7 = vadd.f32 %v383_v4, %v379_v2  ;;  %v391_v8 = vld [vmem:[#allocation2 + $0x10] sm:$0xff]  ;;  %v61_v13 = vmax.f32 %v379_v2, %v383_v4  ;;  %v73_v19 = vld [vmem:[%s476_s1] sm:$0xff] }
  0x16   :  { %v393_v9 = vld [vmem:[#allocation2 + $0x18] sm:$0xff]  ;;  %52 = vadd.xlane.f32.xlu1 %v51_v3  ;;  %v54_v10 = vadd.f32 %v387_v6, %v385_v5  ;;  %v70_v14 = vmax.f32 %v385_v5, %v387_v6  ;;  %v74_v21 = vld [vmem:[%s476_s1 + $0x8] sm:$0xff] }
  0x17   :  { %46 = vadd.xlane.f32.xlu0 %v45_v7  ;;  %v48_v11 = vadd.f32 %v393_v9, %v391_v8  ;;  %v64_v12 = vmax.f32 %v391_v8, %v393_v9 }
  0x1a   :  { %55 = vadd.xlane.f32.xlu1 %v54_v10 }
  0x1b   :  { %49 = vadd.xlane.f32.xlu0 %v48_v11  ;;  %v75_v11 = vld [vmem:[%s477_s2] sm:$0x1] }
  0x1e   :  { %65 = vmax.xlane.f32.xlu1 %v64_v12 }
  0x1f   :  { %62 = vmax.xlane.f32.xlu0 %v61_v13 }
  0x22   :  { %71 = vmax.xlane.f32.xlu1 %v70_v14 }
  0x23   :  { %68 = vmax.xlane.f32.xlu0 %v67_v15  ;;  %v136_v15 = vshrl.u32 %v135_v62, 7 }
  0xa3   :  { %v53_v16 = vpop.xlane.xlu1 %52 }
  0xa4   :  { %v59_v17 = vmul.f32 0.00390625, %v53_v16  ;;  %v47_v18 = vpop.xlane.xlu0 %46 }
  0xa5   :  { %v57_v20 = vmul.f32 0.00390625, %v47_v18 }
  0xa6   :  { %v82_v23 = vmul.f32 %v73_v19, %v59_v17 }
  0xa7   :  { %v56_v22 = vpop.xlane.xlu1 %55  ;;  %v80_v26 = vmul.f32 %v73_v19, %v57_v20 }
  0xa8   :  { %v60_v24 = vmul.f32 0.00390625, %v56_v22  ;;  %v50_v25 = vpop.xlane.xlu0 %49  ;;  %v94_v31 = vsel %vm84_vm0, %v82_v23, 0.0  ;;  %v137_v22 = vsub.s32 0, %v136_v15 }
  0xa9   :  { %v58_v27 = vmul.f32 0.00390625, %v50_v25  ;;  %v85_v35 = vsel %vm84_vm0, %v80_v26, 0.0 }
  0xaa   :  { %v83_v28 = vmul.f32 %v74_v21, %v60_v24 }
  0xab   :  { %v81_v29 = vmul.f32 %v74_v21, %v58_v27  ;;  %v66_v30 = vpop.xlane.xlu1 %65 }
  0xac   :  { %v95_v32 = vsel %vm84_vm0, %v83_v28, 0.0  ;;  %v108_v33 = vmul.f32 %v74_v21, %v66_v30  ;;  %v63_v34 = vpop.xlane.xlu0 %62  ;;  %v76_v30 = vld [vmem:[%s478_s3] sm:$0xff] }
  0xad   :  { %v96_v36 = vadd.f32 %v95_v32, %v94_v31  ;;  %v86_v37 = vsel %vm84_vm0, %v81_v29, 0.0  ;;  %v107_v38 = vmul.f32 %v73_v19, %v63_v34  ;;  %v77_v29 = vld [vmem:[%s478_s3 + $0x8] sm:$0xff] }
  0xae   :  { %v87_v39 = vadd.f32 %v86_v37, %v85_v35  ;;  %v112_v40 = vsel %vm84_vm0, %v108_v33, 0.0 }
  0xaf   :  { %v97_v41 = vrot.slane %v96_v36, 4  ;;  %v111_v42 = vsel %vm84_vm0, %v107_v38, 0.0  ;;  %v72_v43 = vpop.xlane.xlu1 %71 }
  0xb0   :  { %v88_v44 = vrot.slane %v87_v39, 4  ;;  %v113_v45 = vadd.f32 %v112_v40, %v111_v42  ;;  %v110_v46 = vmul.f32 %v74_v21, %v72_v43  ;;  %v69_v47 = vpop.xlane.xlu0 %68 }
  0xb1   :  { %v98_v48 = vadd.f32 %v97_v41, %v96_v36  ;;  %v109_v49 = vmul.f32 %v73_v19, %v69_v47 }
  0xb2   :  { %v89_v50 = vadd.f32 %v88_v44, %v87_v39  ;;  %v114_v51 = vrot.slane %v113_v45, 4  ;;  %v121_v52 = vsel %vm84_vm0, %v110_v46, 0.0  ;;  %v323_v44 = vmov 0   ;;  %v78_v46 = vld [vmem:[%s479_s4] sm:$0xff] }
  0xb3   :  { %v99_v53 = vrot.slane %v98_v48, 2  ;;  %v120_v54 = vsel %vm84_vm0, %v109_v49, 0.0  ;;  %255 = vset.pattern.permute.xlu1 %v323_v44  ;;  %254 = vset.pattern.permute.xlu0 %v323_v44 }
  0xb4   :  { %v90_v55 = vrot.slane %v89_v50, 2  ;;  %v115_v56 = vadd.f32 %v114_v51, %v113_v45  ;;  %v122_v57 = vadd.f32 %v121_v52, %v120_v54  ;;  %v79_v45 = vld [vmem:[%s479_s4 + $0x8] sm:$0xff] }
  0xb5   :  { %v100_v58 = vadd.f32 %v99_v53, %v98_v48 }
  0xb6   :  { %v91_v59 = vadd.f32 %v90_v55, %v89_v50  ;;  %v116_v60 = vrot.slane %v115_v56, 2  ;;  %v123_v61 = vrot.slane %v122_v57, 4 }
  0xb7   :  { %v101_v63 = vrot.slane %v100_v58, 1 }
  0xb8   :  { %v92_v3 = vrot.slane %v91_v59, 1  ;;  %v117_v7 = vadd.f32 %v116_v60, %v115_v56  ;;  %v124_v10 = vadd.f32 %v123_v61, %v122_v57 }
  0xb9   :  { %v102_v19 = vadd.f32 %v101_v63, %v100_v58 }
  0xba   :  { %v118_v12 = vrot.slane %v117_v7, 1  ;;  %v125_v13 = vrot.slane %v124_v10, 2  ;;  %v93_v14 = vadd.f32 %v92_v3, %v91_v59 }
  0xbb   :  { %v104_v26 = vadd.f32 %v102_v19, %v75_v11 }
  0xbc   :  { %v119_v16 = vadd.f32 %v118_v12, %v117_v7  ;;  %v126_v17 = vadd.f32 %v125_v13, %v124_v10  ;;  %v103_v18 = vadd.f32 %v93_v14, %v75_v11 }
  0xbd   :  { %v106_v32 = vmax.f32 %v104_v26, 0.0 }
  0xbe   :  { %v127_v20 = vrot.slane %v126_v17, 1  ;;  %v129_v21 = vadd.f32 %v119_v16, %v75_v11  ;;  %v105_v24 = vmax.f32 %v103_v18, 0.0 }
  0xc0   :  { %v128_v23 = vadd.f32 %v127_v20, %v126_v17  ;;  %v131_v25 = vmax.f32 %v129_v21, 0.0 }
  0xc2   :  { %v133_v27 = vadd.f32 %v131_v25, %v105_v24  ;;  %v130_v28 = vadd.f32 %v128_v23, %v75_v11 }
  0xc4   :  { %v138_v31 = vrot.slane %v133_v27, %v137_v22  ;;  %v132_v33 = vmax.f32 %v130_v28, 0.0 }
  0xc6   :  { %v144_v34 = vmul.f32 %v138_v31, %v77_v29  ;;  %v143_v35 = vmul.f32 %v138_v31, %v76_v30  ;;  %v134_v36 = vadd.f32 %v132_v33, %v106_v32 }
  0xc8   :  { %v150_v37 = vsel %vm84_vm0, %v144_v34, 0.0  ;;  %v147_v38 = vsel %vm84_vm0, %v143_v35, 0.0  ;;  %v142_v39 = vrot.slane %v134_v36, %v137_v22 }
  0xc9   :  { %151 = vadd.xlane.f32.xlu1 %v150_v37  ;;  %148 = vadd.xlane.f32.xlu0 %v147_v38 }
  0xca   :  { %v146_v40 = vmul.f32 %v142_v39, %v77_v29  ;;  %v145_v41 = vmul.f32 %v142_v39, %v76_v30 }
  0xcc   :  { %v156_v42 = vsel %vm84_vm0, %v146_v40, 0.0  ;;  %v153_v43 = vsel %vm84_vm0, %v145_v41, 0.0 }
  0xcd   :  { %157 = vadd.xlane.f32.xlu1 %v156_v42  ;;  %154 = vadd.xlane.f32.xlu0 %v153_v43 }
 0x156   :  { %v152_v47 = vpop.xlane.xlu1 %151  ;;  %v149_v48 = vpop.xlane.xlu0 %148 }
 0x157   :  { %v160_v49 = vadd.f32 %v152_v47, %v79_v45  ;;  %v159_v50 = vadd.f32 %v149_v48, %v78_v46 }
 0x159   :  { %v164_v51 = vsub.f32 0.0, %v160_v49  ;;  %v163_v52 = vsub.f32 0.0, %v159_v50 }
 0x15a   :  { %v158_v53 = vpop.xlane.xlu1 %157  ;;  %v155_v54 = vpop.xlane.xlu0 %154 }
 0x15b   :  { %v169_v55 = vmul.f32 1.442695, %v164_v51  ;;  %v167_v56 = vmul.f32 1.442695, %v163_v52  ;;  %v162_v57 = vadd.f32 %v158_v53, %v79_v45  ;;  %v161_v58 = vadd.f32 %v155_v54, %v78_v46 }
 0x15d   :  { %256 = vpow2.f32 %v169_v55  ;;  %v166_v59 = vsub.f32 0.0, %v162_v57  ;;  %v165_v60 = vsub.f32 0.0, %v161_v58 }
 0x15e   :  { %258 = vpow2.f32 %v167_v56 }
 0x15f   :  { %v173_v61 = vmul.f32 1.442695, %v166_v59  ;;  %v171_v62 = vmul.f32 1.442695, %v165_v60 }
 0x161   :  { %260 = vpow2.f32 %v173_v61 }
 0x162   :  { %262 = vpow2.f32 %v171_v62 }
 0x167   :  { %v257_v63 = vpop.eup %256 }
 0x168   :  { %v259_v3 = vpop.eup %258  ;;  %v176_v7 = vadd.f32 1.0, %v257_v63 }
 0x169   :  { %v175_v10 = vadd.f32 1.0, %v259_v3 }
 0x16a   :  { %264 = vrcp.f32 %v176_v7 }
 0x16b   :  { %v261_v11 = vpop.eup %260  ;;  %266 = vrcp.f32 %v175_v10 }
 0x16c   :  { %v263_v12 = vpop.eup %262  ;;  %v178_v13 = vadd.f32 1.0, %v261_v11 }
 0x16d   :  { %v177_v14 = vadd.f32 1.0, %v263_v12 }
 0x16e   :  { %268 = vrcp.f32 %v178_v13 }
 0x16f   :  { %270 = vrcp.f32 %v177_v14 }
 0x174   :  { %v265_v15 = vpop.eup %264 }
 0x175   :  { %v267_v16 = vpop.eup %266  ;;  %225 = vst.msk [vmem:[%s481_s6 + $0x8] sm:$0xff] %vm223_vm1, %v265_v15  ;;  %194 = vperm.xlu1 %255, %v265_v15  }
 0x176   :  { %224 = vst.msk [vmem:[%s481_s6] sm:$0xff] %vm223_vm1, %v267_v16  ;;  %189 = vperm.xlu0 %254, %v267_v16  }
 0x178   :  { %v269_v17 = vpop.eup %268 }
 0x179   :  { %v271_v18 = vpop.eup %270  ;;  %227 = vst.msk [vmem:[%s481_s6 + $0x18] sm:$0xff] %vm223_vm1, %v269_v17 }
 0x17a   :  { %226 = vst.msk [vmem:[%s481_s6 + $0x10] sm:$0xff] %vm223_vm1, %v271_v18  ;;  %199 = vperm.xlu1 %255, %v271_v18   ;;  %s324_s6 = smov [#allocation5]  }
 0x17b   :  { %s233_s28 = sshll.u32 %s324_s6, 4  ;;  %s234_s28 = int_to_ptr.vmem [resolvable:$true] %s233_s28 }
 0x17c   :  { %s294_s29 = scalar_lea.vmem %s234_s28, 1024  ;;  %p299_p9 = scmp.lt.s32.totalorder %s234_s28, %s234_s28 }
 0x17d   :  { %p295_p8 = scmp.ne.s32.totalorder %s234_s28, %s294_s29  ;;  %p300_p10 = scmp.lt.s32.totalorder %s294_s29, %s294_s29 }
 0x17e   :  { %204 = vperm.xlu1 %255, %v269_v17  }
 0x17f   :  { %p301_p11 = por %p300_p10, %p299_p9 }
 0x181   :  { %p302_p12 = pnand %p301_p11, %p295_p8 }
 0x1f4   :  { %v195_v19 = vpop.permute.xlu1 %194 }
 0x1f5   :  { %v209_v20 = vmul.f32 %v195_v19, %v391_v8  ;;  %v210_v21 = vmul.f32 %v195_v19, %v393_v9  ;;  %v190_v22 = vpop.permute.xlu0 %189 }
 0x1f6   :  { %v207_v23 = vmul.f32 %v190_v22, %v379_v2  ;;  %v208_v24 = vmul.f32 %v190_v22, %v383_v4 }
 0x1f7   :  { %217 = vst [vmem:[#allocation5 + $0x10] sm:$0xff] %v209_v20  ;;  %218 = vst [vmem:[#allocation5 + $0x18] sm:$0xff] %v210_v21 }
 0x1f8   :  { %215 = vst [vmem:[#allocation5] sm:$0xff] %v207_v23  ;;  %216 = vst [vmem:[#allocation5 + $0x8] sm:$0xff] %v208_v24 }
 0x1f9   :  { %v200_v25 = vpop.permute.xlu1 %199 }
 0x1fa   :  { %v211_v26 = vmul.f32 %v200_v25, %v375_v0  ;;  %v212_v27 = vmul.f32 %v200_v25, %v377_v1 }
 0x1fc   :  { %219 = vst [vmem:[#allocation5 + $0x20] sm:$0xff] %v211_v26  ;;  %220 = vst [vmem:[#allocation5 + $0x28] sm:$0xff] %v212_v27 }
 0x1fd   :  { %v205_v8 = vpop.permute.xlu1 %204 }
 0x1fe   :  { %v213_v9 = vmul.f32 %v205_v8, %v385_v5  ;;  %v214_v2 = vmul.f32 %v205_v8, %v387_v6 }
 0x200   :  { %221 = vst [vmem:[#allocation5 + $0x30] sm:$0xff] %v213_v9  ;;  %222 = vst [vmem:[#allocation5 + $0x38] sm:$0xff] %v214_v2 }
 0x201   :  { %305 = shalt.err (!%p302_p12)
}
 0x202   :  { %s306_s10 = scalar_lea.hbm %s480_s5, 1024 }
 0x203   :  { %p307_p13 = scmp.ne.s32.totalorder %s480_s5, %s306_s10  ;;  %p310_p0 = scmp.lt.u32.totalorder %s306_s10, %s480_s5 }
 0x205   :  { %p312_p1 = pnand %p310_p0, %p307_p13 }
 0x207   :  { %315 = shalt.err (!%p312_p1)
}
 0x208   :  { %239 = dma.vmem_to_hbm [thread:$0]  %s234_s28, 1024, %s480_s5, [#allocation4], %s321_s7, %s321_s7, %s322_s8  }
 0x209   :  { %318 = dma.done.wait [#allocation4], 1024  }
 0x20a   :  { %319 = vsyncadd [#allocation4], 4294966272 }
 0x20b   :  { %247 = vsyncpa [#allocation3], 1 }
 0x20c   :  { %248 = vsyncpa [#allocation4], 1 }

</bundles_post_ra>
